<compile_context>
chip_gen: v5e
topology: v5e:2x2
jax: 0.10.0
libtpu: 0.0.40
codegen_flags: <defaults>
</compile_context>

<pallas_src>
import functools

import jax
import jax.numpy as jnp
from jax.experimental import pallas as pl
from jax.experimental.pallas import tpu as pltpu


def _round_up(a, m):
    return (a + m - 1) // m * m


def cnn_kernel(x_ref, w1_ref, b1_ref, w2_ref, b2_ref,
               w3_ref, b3_ref, w4_ref, b4_ref, o_ref):
    """One batch tile. Layout: activations are (features, TB); weights (out, in)."""
    cdt = w1_ref.dtype  # MXU input dtype (f32 or bf16); accumulation is f32.

    # Conv2d(3,16,k=1) on 1x1 spatial == Linear(3,16):  (16,3) @ (3,TB)
    h = jnp.dot(w1_ref[...], x_ref[...], preferred_element_type=jnp.float32)
    h = jnp.maximum(h + b1_ref[...], 0.0)
    # Conv2d(16,32,k=1) == Linear(16,32):  (32,16) @ (16,TB)
    h = jnp.dot(w2_ref[...], h.astype(cdt), preferred_element_type=jnp.float32)
    h = jnp.maximum(h + b2_ref[...], 0.0)
    # Flatten is a no-op (32*1*1 == 32); Linear(32,64):  (64,32) @ (32,TB)
    h = jnp.dot(w3_ref[...], h.astype(cdt), preferred_element_type=jnp.float32)
    h = jnp.maximum(h + b3_ref[...], 0.0)
    # Dropout(0.3): identity in eval mode.
    # TODO(synk): training-mode dropout (pltpu.prng_seed + prng_random_bits mask,
    # scaled by 1/(1-p)) not implemented.
    # Linear(64,3):  (3,64) @ (64,TB)
    o = jnp.dot(w4_ref[...], h.astype(cdt), preferred_element_type=jnp.float32)
    o_ref[...] = (o + b4_ref[...]).astype(o_ref.dtype)


def init_params(key):
    """Deterministic init matching the PyTorch module's shapes.

    Weights stored as (out_features, in_features) (PyTorch order), biases as
    (out_features, 1) column vectors so they broadcast over the lane (batch) axis.
    """
    ks = jax.random.split(key, 8)

    def uniform(k, shape, fan_in):
        bound = 1.0 / jnp.sqrt(float(fan_in))
        return jax.random.uniform(k, shape, jnp.float32, -bound, bound)

    # Conv2d(3, 16, 1): weight (16, 3, 1, 1) -> (16, 3)
    w1 = uniform(ks[0], (16, 3, 1, 1), 3).reshape(16, 3)
    b1 = uniform(ks[1], (16,), 3).reshape(16, 1)
    # Conv2d(16, 32, 1): weight (32, 16, 1, 1) -> (32, 16)
    w2 = uniform(ks[2], (32, 16, 1, 1), 16).reshape(32, 16)
    b2 = uniform(ks[3], (32,), 16).reshape(32, 1)
    # Linear(32, 64): weight (64, 32)
    w3 = uniform(ks[4], (64, 32), 32)
    b3 = uniform(ks[5], (64,), 32).reshape(64, 1)
    # Linear(64, 3): weight (3, 64)
    w4 = uniform(ks[6], (3, 64), 64)
    b4 = uniform(ks[7], (3,), 64).reshape(3, 1)
    return (w1, b1, w2, b2, w3, b3, w4, b4)


@functools.partial(jax.jit, static_argnames=("tb", "compute_dtype"))
def cnn_forward(x_nchw, params, *, tb=8192, compute_dtype=jnp.bfloat16):
    """Forward pass. x_nchw: (N, 3, 1, 1) float32. Returns (N, 3) float32."""
    n = x_nchw.shape[0]
    assert x_nchw.shape[1:] == (3, 1, 1), "Flatten->Linear(32,64) implies 1x1 spatial"
    w1, b1, w2, b2, w3, b3, w4, b4 = params
    cdt = jnp.dtype(compute_dtype)
    cbytes = cdt.itemsize

    # ---- tiling -------------------------------------------------------------
    # VMEM bytes per batch sample in one tile: double-buffered in/out blocks
    # (sublane dim 3 pads to 8) + f32 intermediates (16+32+64) + cdt cast copies.
    per_sample = 2 * 8 * cbytes + 2 * 8 * 4 + 112 * 4 + 112 * cbytes
    # Clamp tile so live VMEM stays ~<=24 MiB -> safe on v7x (64 MiB per TC).
    tb_cap = max(256, ((24 << 20) // per_sample) // 256 * 256)

    n128 = _round_up(n, 128)                      # pad batch only to lane multiple
    tb_req = max(128, min(_round_up(tb, 128), tb_cap, n128))
    g = pl.cdiv(n128, tb_req)
    if g == 1 and n128 >= 256:
        g = 2                                     # keep v7x's second TensorCore busy
    tb_eff = _round_up(pl.cdiv(n128, g), 128)     # balanced, 128-aligned tiles
    n_pad = g * tb_eff                            # over-pad bounded by ~g*128 samples

    # Transposed, lane-dense layout: batch on the lane axis.  transpose + cast
    # + (small) pad form one fused XLA producer, not three HBM passes.
    xt = x_nchw.reshape(n, 3).T.astype(cdt)       # (3, N)
    if n_pad != n:
        xt = jnp.pad(xt, ((0, 0), (0, n_pad - n)))

    ws = [w1.astype(cdt), w2.astype(cdt), w3.astype(cdt), w4.astype(cdt)]
    bs = [b1, b2, b3, b4]                         # biases stay f32

    def resident(a):   # full-array block, constant index map -> loaded once
        return pl.BlockSpec(a.shape, lambda i: (0, 0))

    # NOTE: on v5e, if input DMA is still exposed in xprof, the x spec can take
    # pipeline_mode=pl.Buffered(3) for a third buffer (few-% win, tiny VMEM).
    in_specs = [pl.BlockSpec((3, tb_eff), lambda i: (0, i))]
    operands = [xt]
    for w, b in zip(ws, bs):
        in_specs += [resident(w), resident(b)]
        operands += [w, b]

    param_bytes = sum(int(a.size) * a.dtype.itemsize for a in operands[1:])
    cost = pl.CostEstimate(
        flops=5600 * n_pad,  # 2*(3*16 + 16*32 + 32*64 + 64*3) per sample
        transcendentals=0,
        bytes_accessed=3 * n_pad * cbytes + 3 * n_pad * 4 + param_bytes,
    )

    # Explicit VMEM limit from the budget (headroom included), capped well below
    # v7x's 64 MiB physical VMEM per TensorCore.
    vmem_need = per_sample * tb_eff + 4 * param_bytes + (4 << 20)
    vmem_limit = int(min(max(vmem_need, 16 << 20), 48 << 20))

    out_t = pl.pallas_call(
        cnn_kernel,
        out_shape=jax.ShapeDtypeStruct((3, n_pad), jnp.float32),
        grid=(g,),
        in_specs=in_specs,
        out_specs=pl.BlockSpec((3, tb_eff), lambda i: (0, i)),
        compiler_params=pltpu.CompilerParams(
            # pltpu.CORE_PARALLEL is a v7x-only option to force per-core sharding;
            # PARALLEL is safe on all generations.
            dimension_semantics=(pltpu.PARALLEL,),
            vmem_limit_bytes=vmem_limit,
        ),
        cost_estimate=cost,
    )(*operands)

    return out_t[:, :n].T                         # (N, 3)


def ref_forward(x_nchw, params, compute_dtype=jnp.float32):
    """Plain-JAX reference with identical dtype handling."""
    w1, b1, w2, b2, w3, b3, w4, b4 = params
    cdt = compute_dtype
    h = x_nchw.reshape(x_nchw.shape[0], 3).T.astype(cdt)
    h = jnp.maximum(jnp.dot(w1.astype(cdt), h, preferred_element_type=jnp.float32) + b1, 0.0)
    h = jnp.maximum(jnp.dot(w2.astype(cdt), h.astype(cdt), preferred_element_type=jnp.float32) + b2, 0.0)
    h = jnp.maximum(jnp.dot(w3.astype(cdt), h.astype(cdt), preferred_element_type=jnp.float32) + b3, 0.0)
    o = jnp.dot(w4.astype(cdt), h.astype(cdt), preferred_element_type=jnp.float32) + b4
    return o.T


if __name__ == "__main__":
    key = jax.random.PRNGKey(0)
    k_x, k_p, k_big = jax.random.split(key, 3)
    params = init_params(k_p)

    # Small input consistent with the module: NCHW, 3 channels, 1x1 spatial.
    x = jax.random.normal(k_x, (8, 3, 1, 1), dtype=jnp.float32)
    out = cnn_forward(x, params, compute_dtype=jnp.float32)
    jax.block_until_ready(out)
    assert out.shape == (8, 3)
    assert jnp.allclose(out, ref_forward(x, params), atol=1e-5, rtol=1e-5)

    # Non-128-multiple batch, multi-tile grid (exercises padding + g>=2), f32 path.
    x_big = jax.random.normal(k_big, (3000, 3, 1, 1), dtype=jnp.float32)
    out_big = cnn_forward(x_big, params, compute_dtype=jnp.float32)
    jax.block_until_ready(out_big)
    assert out_big.shape == (3000, 3)
    assert jnp.allclose(out_big, ref_forward(x_big, params), atol=1e-5, rtol=1e-5)

    # Default path: bf16 compute (f32 accumulation/output).
    out_bf16 = cnn_forward(x_big, params)
    jax.block_until_ready(out_bf16)
    ref_bf16 = ref_forward(x_big, params, compute_dtype=jnp.bfloat16)
    assert jnp.allclose(out_bf16, ref_bf16, atol=2e-2, rtol=2e-2)

    print("KERNEL_OK")
</pallas_src>

<mosaic_0001>
module attributes {stable_mosaic.version = 11 : i64} {
  func.func @cnn_kernel(%arg0: i32, %arg1: memref<3x128xf32, #tpu.memory_space<vmem>>, %arg2: memref<16x3xf32, #tpu.memory_space<vmem>>, %arg3: memref<16x1xf32, #tpu.memory_space<vmem>>, %arg4: memref<32x16xf32, #tpu.memory_space<vmem>>, %arg5: memref<32x1xf32, #tpu.memory_space<vmem>>, %arg6: memref<64x32xf32, #tpu.memory_space<vmem>>, %arg7: memref<64x1xf32, #tpu.memory_space<vmem>>, %arg8: memref<3x64xf32, #tpu.memory_space<vmem>>, %arg9: memref<3x1xf32, #tpu.memory_space<vmem>>, %arg10: memref<3x128xf32, #tpu.memory_space<vmem>>) attributes {dimension_semantics = [#tpu.dimension_semantics<parallel>], iteration_bounds = array<i64: 1>, scalar_prefetch = 0 : i64, scratch_operands = 0 : i64, tpu.core_type = #tpu.core_type<tc>, window_params = [{transform_indices = @transform_0, window_bounds = array<i64: 3, 128>}, {pipeline_mode = #tpu.pipeline_mode<synchronous>, transform_indices = @transform_1, window_bounds = array<i64: 16, 3>}, {pipeline_mode = #tpu.pipeline_mode<synchronous>, transform_indices = @transform_2, window_bounds = array<i64: 16, 1>}, {pipeline_mode = #tpu.pipeline_mode<synchronous>, transform_indices = @transform_3, window_bounds = array<i64: 32, 16>}, {pipeline_mode = #tpu.pipeline_mode<synchronous>, transform_indices = @transform_4, window_bounds = array<i64: 32, 1>}, {pipeline_mode = #tpu.pipeline_mode<synchronous>, transform_indices = @transform_5, window_bounds = array<i64: 64, 32>}, {pipeline_mode = #tpu.pipeline_mode<synchronous>, transform_indices = @transform_6, window_bounds = array<i64: 64, 1>}, {pipeline_mode = #tpu.pipeline_mode<synchronous>, transform_indices = @transform_7, window_bounds = array<i64: 3, 64>}, {pipeline_mode = #tpu.pipeline_mode<synchronous>, transform_indices = @transform_8, window_bounds = array<i64: 3, 1>}, {transform_indices = @transform_9, window_bounds = array<i64: 3, 128>}]} {
    %c0 = arith.constant 0 : index
    %c0_0 = arith.constant 0 : index
    %0 = vector.load %arg2[%c0, %c0_0] : memref<16x3xf32, #tpu.memory_space<vmem>>, vector<16x3xf32>
    %c0_1 = arith.constant 0 : index
    %c0_2 = arith.constant 0 : index
    %1 = vector.load %arg1[%c0_1, %c0_2] : memref<3x128xf32, #tpu.memory_space<vmem>>, vector<3x128xf32>
    %cst = arith.constant dense<0.000000e+00> : vector<16x128xf32>
    %2 = tpu.matmul %0, %1, %cst {dimension_numbers = #tpu.dot_dimension_numbers<[1], [0], [0], [1], [0, 0, 1, 1], [], []>} : vector<16x3xf32>, vector<3x128xf32>, vector<16x128xf32> -> vector<16x128xf32>
    %c0_3 = arith.constant 0 : index
    %c0_4 = arith.constant 0 : index
    %3 = vector.load %arg3[%c0_3, %c0_4] : memref<16x1xf32, #tpu.memory_space<vmem>>, vector<16x1xf32>
    %4 = vector.broadcast %3 : vector<16x1xf32> to vector<16x128xf32>
    %5 = arith.addf %2, %4 : vector<16x128xf32>
    %cst_5 = arith.constant 0.000000e+00 : f32
    %6 = vector.broadcast %cst_5 : f32 to vector<16x128xf32>
    %7 = arith.maximumf %5, %6 : vector<16x128xf32>
    %c0_6 = arith.constant 0 : index
    %c0_7 = arith.constant 0 : index
    %8 = vector.load %arg4[%c0_6, %c0_7] : memref<32x16xf32, #tpu.memory_space<vmem>>, vector<32x16xf32>
    %cst_8 = arith.constant dense<0.000000e+00> : vector<32x128xf32>
    %9 = tpu.matmul %8, %7, %cst_8 {dimension_numbers = #tpu.dot_dimension_numbers<[1], [0], [0], [1], [0, 0, 1, 1], [], []>} : vector<32x16xf32>, vector<16x128xf32>, vector<32x128xf32> -> vector<32x128xf32>
    %c0_9 = arith.constant 0 : index
    %c0_10 = arith.constant 0 : index
    %10 = vector.load %arg5[%c0_9, %c0_10] : memref<32x1xf32, #tpu.memory_space<vmem>>, vector<32x1xf32>
    %11 = vector.broadcast %10 : vector<32x1xf32> to vector<32x128xf32>
    %12 = arith.addf %9, %11 : vector<32x128xf32>
    %cst_11 = arith.constant 0.000000e+00 : f32
    %13 = vector.broadcast %cst_11 : f32 to vector<32x128xf32>
    %14 = arith.maximumf %12, %13 : vector<32x128xf32>
    %c0_12 = arith.constant 0 : index
    %c0_13 = arith.constant 0 : index
    %15 = vector.load %arg6[%c0_12, %c0_13] : memref<64x32xf32, #tpu.memory_space<vmem>>, vector<64x32xf32>
    %cst_14 = arith.constant dense<0.000000e+00> : vector<64x128xf32>
    %16 = tpu.matmul %15, %14, %cst_14 {dimension_numbers = #tpu.dot_dimension_numbers<[1], [0], [0], [1], [0, 0, 1, 1], [], []>} : vector<64x32xf32>, vector<32x128xf32>, vector<64x128xf32> -> vector<64x128xf32>
    %c0_15 = arith.constant 0 : index
    %c0_16 = arith.constant 0 : index
    %17 = vector.load %arg7[%c0_15, %c0_16] : memref<64x1xf32, #tpu.memory_space<vmem>>, vector<64x1xf32>
    %18 = vector.broadcast %17 : vector<64x1xf32> to vector<64x128xf32>
    %19 = arith.addf %16, %18 : vector<64x128xf32>
    %cst_17 = arith.constant 0.000000e+00 : f32
    %20 = vector.broadcast %cst_17 : f32 to vector<64x128xf32>
    %21 = arith.maximumf %19, %20 : vector<64x128xf32>
    %c0_18 = arith.constant 0 : index
    %c0_19 = arith.constant 0 : index
    %22 = vector.load %arg8[%c0_18, %c0_19] : memref<3x64xf32, #tpu.memory_space<vmem>>, vector<3x64xf32>
    %cst_20 = arith.constant dense<0.000000e+00> : vector<3x128xf32>
    %23 = tpu.matmul %22, %21, %cst_20 {dimension_numbers = #tpu.dot_dimension_numbers<[1], [0], [0], [1], [0, 0, 1, 1], [], []>} : vector<3x64xf32>, vector<64x128xf32>, vector<3x128xf32> -> vector<3x128xf32>
    %c0_21 = arith.constant 0 : index
    %c0_22 = arith.constant 0 : index
    %24 = vector.load %arg9[%c0_21, %c0_22] : memref<3x1xf32, #tpu.memory_space<vmem>>, vector<3x1xf32>
    %25 = vector.broadcast %24 : vector<3x1xf32> to vector<3x128xf32>
    %26 = arith.addf %23, %25 : vector<3x128xf32>
    %c0_23 = arith.constant 0 : index
    %c0_24 = arith.constant 0 : index
    %27 = vector.load %arg10[%c0_23, %c0_24] : memref<3x128xf32, #tpu.memory_space<vmem>>, vector<3x128xf32>
    tpu.vector_store %arg10[%c0_23, %c0_24], %26 {strides = array<i32>} : memref<3x128xf32, #tpu.memory_space<vmem>>, vector<3x128xf32>,
    return
  }
  func.func @transform_0(%arg0: i32) -> (i32, i32) {
    %c0_i32 = arith.constant 0 : i32
    %c0_i32_0 = arith.constant 0 : i32
    return %c0_i32, %arg0 : i32, i32
  }
  func.func @transform_1(%arg0: i32) -> (i32, i32) {
    %c0_i32 = arith.constant 0 : i32
    %c0_i32_0 = arith.constant 0 : i32
    %c0_i32_1 = arith.constant 0 : i32
    return %c0_i32, %c0_i32_0 : i32, i32
  }
  func.func @transform_2(%arg0: i32) -> (i32, i32) {
    %c0_i32 = arith.constant 0 : i32
    %c0_i32_0 = arith.constant 0 : i32
    %c0_i32_1 = arith.constant 0 : i32
    return %c0_i32, %c0_i32_0 : i32, i32
  }
  func.func @transform_3(%arg0: i32) -> (i32, i32) {
    %c0_i32 = arith.constant 0 : i32
    %c0_i32_0 = arith.constant 0 : i32
    %c0_i32_1 = arith.constant 0 : i32
    return %c0_i32, %c0_i32_0 : i32, i32
  }
  func.func @transform_4(%arg0: i32) -> (i32, i32) {
    %c0_i32 = arith.constant 0 : i32
    %c0_i32_0 = arith.constant 0 : i32
    %c0_i32_1 = arith.constant 0 : i32
    return %c0_i32, %c0_i32_0 : i32, i32
  }
  func.func @transform_5(%arg0: i32) -> (i32, i32) {
    %c0_i32 = arith.constant 0 : i32
    %c0_i32_0 = arith.constant 0 : i32
    %c0_i32_1 = arith.constant 0 : i32
    return %c0_i32, %c0_i32_0 : i32, i32
  }
  func.func @transform_6(%arg0: i32) -> (i32, i32) {
    %c0_i32 = arith.constant 0 : i32
    %c0_i32_0 = arith.constant 0 : i32
    %c0_i32_1 = arith.constant 0 : i32
    return %c0_i32, %c0_i32_0 : i32, i32
  }
  func.func @transform_7(%arg0: i32) -> (i32, i32) {
    %c0_i32 = arith.constant 0 : i32
    %c0_i32_0 = arith.constant 0 : i32
    %c0_i32_1 = arith.constant 0 : i32
    return %c0_i32, %c0_i32_0 : i32, i32
  }
  func.func @transform_8(%arg0: i32) -> (i32, i32) {
    %c0_i32 = arith.constant 0 : i32
    %c0_i32_0 = arith.constant 0 : i32
    %c0_i32_1 = arith.constant 0 : i32
    return %c0_i32, %c0_i32_0 : i32, i32
  }
  func.func @transform_9(%arg0: i32) -> (i32, i32) {
    %c0_i32 = arith.constant 0 : i32
    %c0_i32_0 = arith.constant 0 : i32
    return %c0_i32, %arg0 : i32, i32
  }
}

</mosaic_0001>

<bundles_post_ra>
// kernel: cnn_forward.1
= control target key start
LH: loop header
LB: loop body
LE: loop exit
PB: predicated region body
PF: predicated region fallthrough
CT: control target
= control target key end

     0   :  { %vm54_vm0 = vcmask 1042432   ;;  %vm47_vm1 = vcmask 23552   ;;  %v347_v0 = vmov 0   ;;  %vm111_vm2 = vcmask 130048   ;;  %s506_s2 = inlined_call_operand.vmem [shape: f32[16,1], index: 2, kind: input, shape index: {}]   ;;  %s507_s0 = inlined_call_operand.vmem [shape: f32[3,128], index: 0, kind: input, shape index: {}]   ;;  %s508_s1 = inlined_call_operand.vmem [shape: f32[16,3], index: 1, kind: input, shape index: {}]   ;;  %s509_s6 = inlined_call_operand.vmem [shape: f32[64,1], index: 6, kind: input, shape index: {}]   ;;  %s510_s4 = inlined_call_operand.vmem [shape: f32[32,1], index: 4, kind: input, shape index: {}]   ;;  %s511_s3 = inlined_call_operand.vmem [shape: f32[32,16], index: 3, kind: input, shape index: {}]   ;;  %s512_s8 = inlined_call_operand.vmem [shape: f32[3,1], index: 8, kind: input, shape index: {}]   ;;  %s513_s5 = inlined_call_operand.vmem [shape: f32[64,32], index: 5, kind: input, shape index: {}]   ;;  %s514_s7 = inlined_call_operand.vmem [shape: f32[3,64], index: 7, kind: input, shape index: {}]   ;;  %s515_s9 = inlined_call_operand.vmem [shape: f32[3,128], index: 9, kind: output, shape index: {}]  }
   0x1   :  { %344 = vset.pattern.permute.xlu0 %v347_v0  ;;  %v36_v1 = vld [vmem:[%s506_s2 + $0x8] sm:$0xff]  ;;  %v34_v2 = vld [vmem:[%s507_s0] sm:$0x7]  ;;  %345 = vset.pattern.permute.xlu1 %v347_v0  ;;  %v172_v6 = vld [vmem:[%s509_s6 + $0x38] sm:$0xff]  ;;  %vm213_vm3 = vcmask 261120   ;;  %vm294_vm4 = vcmask 523264  }
   0x2   :  { %v32_v3 = vld [vmem:[%s508_s1] sm:$0xff]  ;;  %44 = vperm.xlu0 %344, %v36_v1   ;;  %323 = vmatpush.msk.msra.mxu3 %vm54_vm0, %v34_v2  ;;  %v33_v5 = vld [vmem:[%s508_s1 + $0x8] sm:$0xff]  ;;  %v90_v9 = vld [vmem:[%s510_s4 + $0x18] sm:$0xff] }
   0x3   :  { %324 = vmatmul.msk.f32.vlgmr.msra.gmra.mxu3 %vm47_vm1, %v32_v3  ;;  %346 = vset.pattern.permute.xlu2 %v347_v0  ;;  %v35_v4 = vld [vmem:[%s506_s2] sm:$0xff]  ;;  %v166_v8 = vld [vmem:[%s509_s6 + $0x8] sm:$0xff]  ;;  %v89_v10 = vld [vmem:[%s510_s4 + $0x10] sm:$0xff] }
   0x4   :  { %v169_v7 = vld [vmem:[%s509_s6 + $0x20] sm:$0xff]  ;;  %108 = vperm.xlu1 %345, %v90_v9   ;;  %v171_v11 = vld [vmem:[%s509_s6 + $0x30] sm:$0xff]  ;;  %v168_v14 = vld [vmem:[%s509_s6 + $0x18] sm:$0xff] }
   0x5   :  { %v88_v17 = vld [vmem:[%s510_s4 + $0x8] sm:$0xff]  ;;  %v165_v18 = vld [vmem:[%s509_s6] sm:$0xff]  ;;  %v85_v27 = vld [vmem:[%s511_s3 + $0x10] sm:$0xff] }
   0x6   :  { %98 = vperm.xlu2 %346, %v88_v17   ;;  %v83_v23 = vld [vmem:[%s511_s3] sm:$0xff]  ;;  %v84_v25 = vld [vmem:[%s511_s3 + $0x8] sm:$0xff]  ;;  %v167_v28 = vld [vmem:[%s509_s6 + $0x10] sm:$0xff] }
   0x7   :  { %v87_v24 = vld [vmem:[%s510_s4] sm:$0xff]  ;;  %v170_v26 = vld [vmem:[%s509_s6 + $0x28] sm:$0xff]  ;;  %v86_v29 = vld [vmem:[%s511_s3 + $0x18] sm:$0xff] }
   0x8   :  { %v288_v30 = vld [vmem:[%s512_s8] sm:$0x7]  ;;  %v158_v49 = vld [vmem:[%s513_s5 + $0x8] sm:$0xff]  ;;  %v159_v51 = vld [vmem:[%s513_s5 + $0x10] sm:$0xff] }
   0x9   :  { %v157_v47 = vld [vmem:[%s513_s5] sm:$0xff]  ;;  %v162_v50 = vld [vmem:[%s513_s5 + $0x28] sm:$0xff]  ;;  %v163_v52 = vld [vmem:[%s513_s5 + $0x30] sm:$0xff] }
   0xa   :  { %39 = vperm.xlu0 %344, %v35_v4   ;;  %v161_v48 = vld [vmem:[%s513_s5 + $0x20] sm:$0xff]  ;;  %v160_v53 = vld [vmem:[%s513_s5 + $0x18] sm:$0xff] }
   0xb   :  { %325 = vmatmul.msk.f32.gmra.mxu3 %vm47_vm1, %v33_v5  ;;  %v164_v54 = vld [vmem:[%s513_s5 + $0x38] sm:$0xff] }
   0xc   :  { %103 = vperm.xlu1 %345, %v89_v10  }
   0xe   :  { %93 = vperm.xlu2 %346, %v87_v24  }
  0x12   :  { %210 = vperm.xlu0 %344, %v172_v6  }
  0x14   :  { %205 = vperm.xlu1 %345, %v171_v11  }
  0x16   :  { %200 = vperm.xlu2 %346, %v170_v26  }
  0x1a   :  { %195 = vperm.xlu0 %344, %v169_v7  }
  0x1c   :  { %190 = vperm.xlu1 %345, %v168_v14  }
  0x1e   :  { %185 = vperm.xlu2 %346, %v167_v28  }
  0x22   :  { %180 = vperm.xlu0 %344, %v166_v8  }
  0x24   :  { %175 = vperm.xlu1 %345, %v165_v18  }
  0x26   :  { %291 = vperm.xlu2 %346, %v288_v30  }
  0x60   :  { %v99_v35 = vpop.permute.xlu2 %98 }
  0x68   :  { %v94_v42 = vpop.permute.xlu2 %93 }
  0x70   :  { %v201_v63 = vpop.permute.xlu2 %200 }
  0x74   :  { %v45_v12 = vpop.permute.xlu0 %44 }
  0x76   :  { %v109_v33 = vpop.permute.xlu1 %108 }
  0x7c   :  { %v40_v15 = vpop.permute.xlu0 %39 }
  0x7e   :  { %v104_v36 = vpop.permute.xlu1 %103 }
  0x84   :  { %v211_v59 = vpop.permute.xlu0 %210 }
  0x86   :  { %v75_v13 = vpop.f32.mrf.mxu3  ;;  %v206_v60 = vpop.permute.xlu1 %205 }
  0x87   :  { %v76_v19 = vadd.f32 %v75_v13, %v40_v15 }
  0x89   :  { %v81_v22 = vmax.f32 %v76_v19, 0.0 }
  0x8c   :  { %v196_v0 = vpop.permute.xlu0 %195 }
  0x8e   :  { %v78_v16 = vpop.f32.mrf.mxu3  ;;  %v191_v4 = vpop.permute.xlu1 %190 }
  0x8f   :  { %v79_v20 = vadd.f32 %v78_v16, %v45_v12  ;;  %v186_v12 = vpop.permute.xlu2 %185 }
  0x91   :  { %v82_v21 = vmax.f32 %v79_v20, 0.0 }
  0x93   :  { %138 = vmatpush.msra.mxu1 %v82_v21 }
  0x94   :  { %v181_v15 = vpop.permute.xlu0 %180 }
  0x95   :  { %139 = vmatpush.msra.mxu1 %v81_v22 }
  0x96   :  { %326 = vmatmul.msk.f32.vlgmr.msra.gmra.mxu1 %vm111_vm2, %v83_v23  ;;  %v176_v18 = vpop.permute.xlu1 %175  ;;  %v287_v23 = vld [vmem:[%s514_s7] sm:$0x7] }
  0x97   :  { %v292_v24 = vpop.permute.xlu2 %291 }
  0x9e   :  { %327 = vmatmul.msk.f32.gmra.mxu1 %vm111_vm2, %v84_v25 }
  0xa6   :  { %328 = vmatmul.msk.f32.gmra.mxu1 %vm111_vm2, %v85_v27 }
  0xae   :  { %329 = vmatmul.msk.f32.gmra.mxu1 %vm111_vm2, %v86_v29 }
 0x113   :  { %v141_v31 = vpop.f32.mrf.mxu1 }
 0x114   :  { %v142_v43 = vadd.f32 %v141_v31, %v94_v42 }
 0x116   :  { %v153_v46 = vmax.f32 %v142_v43, 0.0 }
 0x11b   :  { %v144_v32 = vpop.f32.mrf.mxu1 }
 0x11c   :  { %v145_v40 = vadd.f32 %v144_v32, %v99_v35 }
 0x11e   :  { %v154_v45 = vmax.f32 %v145_v40, 0.0 }
 0x123   :  { %v147_v34 = vpop.f32.mrf.mxu1 }
 0x124   :  { %v148_v38 = vadd.f32 %v147_v34, %v104_v36 }
 0x126   :  { %v155_v44 = vmax.f32 %v148_v38, 0.0 }
 0x12b   :  { %v150_v37 = vpop.f32.mrf.mxu1 }
 0x12c   :  { %v151_v39 = vadd.f32 %v150_v37, %v109_v33 }
 0x12e   :  { %v156_v41 = vmax.f32 %v151_v39, 0.0 }
 0x130   :  { %250 = vmatpush.msra.mxu0 %v156_v41  ;;  %339 = vmatpush.msra.mxu2 %v156_v41 }
 0x132   :  { %251 = vmatpush.msra.mxu0 %v155_v44  ;;  %340 = vmatpush.msra.mxu2 %v155_v44 }
 0x134   :  { %252 = vmatpush.msra.mxu0 %v154_v45  ;;  %341 = vmatpush.msra.mxu2 %v154_v45 }
 0x136   :  { %253 = vmatpush.msra.mxu0 %v153_v46  ;;  %342 = vmatpush.msra.mxu2 %v153_v46 }
 0x137   :  { %330 = vmatmul.msk.f32.vlgmr.msra.gmra.mxu0 %vm213_vm3, %v157_v47  ;;  %334 = vmatmul.msk.f32.vlgmr.msra.gmra.mxu2 %vm213_vm3, %v161_v48 }
 0x13f   :  { %331 = vmatmul.msk.f32.gmra.mxu0 %vm213_vm3, %v158_v49  ;;  %335 = vmatmul.msk.f32.gmra.mxu2 %vm213_vm3, %v162_v50 }
 0x147   :  { %332 = vmatmul.msk.f32.gmra.mxu0 %vm213_vm3, %v159_v51  ;;  %336 = vmatmul.msk.f32.gmra.mxu2 %vm213_vm3, %v163_v52 }
 0x14f   :  { %333 = vmatmul.msk.f32.gmra.mxu0 %vm213_vm3, %v160_v53  ;;  %337 = vmatmul.msk.f32.gmra.mxu2 %vm213_vm3, %v164_v54 }
 0x1b4   :  { %v255_v55 = vpop.f32.mrf.mxu0 }
 0x1b5   :  { %v256_v19 = vadd.f32 %v255_v55, %v176_v18 }
 0x1b7   :  { %v279_v22 = vmax.f32 %v256_v19, 0.0 }
 0x1ba   :  { %v267_v56 = vpop.f32.mrf.mxu2 }
 0x1bb   :  { %v268_v8 = vadd.f32 %v267_v56, %v196_v0 }
 0x1bc   :  { %v258_v57 = vpop.f32.mrf.mxu0 }
 0x1bd   :  { %v283_v13 = vmax.f32 %v268_v8, 0.0  ;;  %v259_v16 = vadd.f32 %v258_v57, %v181_v15 }
 0x1bf   :  { %v280_v21 = vmax.f32 %v259_v16, 0.0 }
 0x1c2   :  { %v270_v58 = vpop.f32.mrf.mxu2 }
 0x1c3   :  { %v271_v5 = vadd.f32 %v270_v58, %v201_v63 }
 0x1c4   :  { %v261_v62 = vpop.f32.mrf.mxu0 }
 0x1c5   :  { %v284_v10 = vmax.f32 %v271_v5, 0.0  ;;  %v262_v14 = vadd.f32 %v261_v62, %v186_v12 }
 0x1c7   :  { %v281_v20 = vmax.f32 %v262_v14, 0.0 }
 0x1ca   :  { %v273_v61 = vpop.f32.mrf.mxu2 }
 0x1cb   :  { %v274_v2 = vadd.f32 %v273_v61, %v206_v60 }
 0x1cc   :  { %v264_v7 = vpop.f32.mrf.mxu0 }
 0x1cd   :  { %v285_v9 = vmax.f32 %v274_v2, 0.0  ;;  %v265_v11 = vadd.f32 %v264_v7, %v191_v4 }
 0x1cf   :  { %v282_v17 = vmax.f32 %v265_v11, 0.0 }
 0x1d2   :  { %v276_v1 = vpop.f32.mrf.mxu2 }
 0x1d3   :  { %v277_v3 = vadd.f32 %v276_v1, %v211_v59 }
 0x1d5   :  { %v286_v6 = vmax.f32 %v277_v3, 0.0 }
 0x1d7   :  { %306 = vmatpush.msrb.mxu3 %v286_v6 }
 0x1d9   :  { %307 = vmatpush.msrb.mxu3 %v285_v9 }
 0x1db   :  { %308 = vmatpush.msrb.mxu3 %v284_v10 }
 0x1dd   :  { %309 = vmatpush.msrb.mxu3 %v283_v13 }
 0x1df   :  { %310 = vmatpush.msrb.mxu3 %v282_v17 }
 0x1e1   :  { %311 = vmatpush.msrb.mxu3 %v281_v20 }
 0x1e3   :  { %312 = vmatpush.msrb.mxu3 %v280_v21 }
 0x1e5   :  { %313 = vmatpush.msrb.mxu3 %v279_v22 }
 0x1e6   :  { %338 = vmatmul.msk.f32.vlgmr.msrb.gmra.mxu3 %vm294_vm4, %v287_v23 }
 0x269   :  { %v315_v25 = vpop.f32.mrf.mxu3 }
 0x26a   :  { %v316_v26 = vadd.f32 %v315_v25, %v292_v24 }
 0x26c   :  { %318 = vst [vmem:[%s515_s9] sm:$0x7] %v316_v26 }

</bundles_post_ra>
